<compile_context>
chip_gen: v6e
topology: v6e:2x2x1
jax: 0.10.0
libtpu: 0.0.40
codegen_flags: <defaults>
</compile_context>

<pallas_src>
from functools import partial

import jax
import jax.numpy as jnp
from jax import lax
from jax.experimental import pallas as pl
from jax.experimental.pallas import tpu as pltpu

LANE = 128


def _round_up(x, m):
    return (x + m - 1) // m * m


def _vmem_limit(need_bytes):
    # 2x headroom for compiler-internal scratch; never below the 32 MiB default.
    return int(min(max(2 * need_bytes, 32 * 1024 * 1024), 128 * 1024 * 1024))


# -----------------------------------------------------------------------------
# Kernel 1 (row-tiled): out_tile = a_tile @ b + bias   (bf16 operands, f32 acc)
# Used for x @ W1 (zero bias), adj @ XW1 + b1, adj @ MW2 + b2.
# -----------------------------------------------------------------------------
def _rowtile_matmul_bias_kernel(a_ref, b_ref, bias_ref, o_ref):
    acc = jnp.dot(a_ref[...], b_ref[...], preferred_element_type=jnp.float32)
    o_ref[...] = (acc + bias_ref[...].astype(jnp.float32)).astype(o_ref.dtype)


def _rowtile_matmul_bias(a, b, bias, *, tile_m, out_dtype):
    m, k = a.shape
    _, f = b.shape
    assert m % tile_m == 0 and tile_m % 8 == 0
    assert f % LANE == 0  # lane-dense output

    need = 2 * (tile_m * k * a.dtype.itemsize          # streamed a tiles (double buffered)
                + k * f * b.dtype.itemsize             # resident operand
                + f * bias.dtype.itemsize              # resident bias
                + tile_m * f * jnp.dtype(out_dtype).itemsize)  # output tiles

    return pl.pallas_call(
        _rowtile_matmul_bias_kernel,
        out_shape=jax.ShapeDtypeStruct((m, f), out_dtype),
        grid_spec=pltpu.PrefetchScalarGridSpec(
            num_scalar_prefetch=0,
            grid=(m // tile_m,),
            in_specs=[
                pl.BlockSpec((tile_m, k), lambda i: (i, 0)),   # streamed row tiles
                pl.BlockSpec((k, f), lambda i: (0, 0)),        # resident (fetched once)
                pl.BlockSpec((1, f), lambda i: (0, 0)),        # resident bias
            ],
            out_specs=pl.BlockSpec((tile_m, f), lambda i: (i, 0)),
        ),
        compiler_params=pltpu.CompilerParams(
            dimension_semantics=("parallel",),
            vmem_limit_bytes=_vmem_limit(need),
        ),
    )(a, b, bias)


# -----------------------------------------------------------------------------
# Kernel 2 (single block): MW2 = relu(PairNorm(H1)) @ W2
# PairNorm needs global (over all nodes) statistics, so this runs on the full
# (N, nhid_pad) matrix -- tiny compared to the (N, N) adjacency streams.
# Padded lanes of H1 are exactly zero, so the statistics match the unpadded math.
# -----------------------------------------------------------------------------
def _pairnorm_relu_matmul_kernel(h_ref, w2_ref, o_ref, *, norm_mode, norm_scale):
    h = h_ref[...]  # (N, Fh) float32
    if norm_mode != 'None':
        col_mean = jnp.mean(h, axis=0, keepdims=True)                     # (1, Fh)
        if norm_mode == 'PN':
            h = h - col_mean
            sq = jnp.sum(h * h, axis=1, keepdims=True)                    # (N, 1)
            inv = lax.rsqrt(1e-6 + jnp.mean(sq, axis=0, keepdims=True))   # (1, 1)
            h = (norm_scale * h) * inv
        elif norm_mode == 'PN-SI':
            h = h - col_mean
            inv = lax.rsqrt(1e-6 + jnp.sum(h * h, axis=1, keepdims=True))
            h = (norm_scale * h) * inv
        elif norm_mode == 'PN-SCS':
            inv = lax.rsqrt(1e-6 + jnp.sum(h * h, axis=1, keepdims=True))
            h = (norm_scale * h) * inv - col_mean
    h = jnp.maximum(h, 0.0)
    o_ref[...] = jnp.dot(h.astype(w2_ref.dtype), w2_ref[...],
                         preferred_element_type=jnp.float32).astype(o_ref.dtype)


def _pairnorm_relu_matmul(h, w2, *, norm_mode, norm_scale, out_dtype):
    n, fh = h.shape
    _, fo = w2.shape
    need = 2 * (h.size * h.dtype.itemsize + w2.size * w2.dtype.itemsize
                + n * fo * jnp.dtype(out_dtype).itemsize)
    kernel = partial(_pairnorm_relu_matmul_kernel,
                     norm_mode=norm_mode, norm_scale=float(norm_scale))
    return pl.pallas_call(
        kernel,
        out_shape=jax.ShapeDtypeStruct((n, fo), out_dtype),
        grid_spec=pltpu.PrefetchScalarGridSpec(
            num_scalar_prefetch=0,
            grid=(1,),
            in_specs=[
                pl.BlockSpec((n, fh), lambda i: (0, 0)),
                pl.BlockSpec((fh, fo), lambda i: (0, 0)),
            ],
            out_specs=pl.BlockSpec((n, fo), lambda i: (0, 0)),
        ),
        compiler_params=pltpu.CompilerParams(
            dimension_semantics=("arbitrary",),
            vmem_limit_bytes=_vmem_limit(need),
        ),
    )(h, w2)


# -----------------------------------------------------------------------------
# Full GCN forward (eval mode).
# -----------------------------------------------------------------------------
def gcn_forward(x, adj, w1, b1, w2, b2, *, norm_mode='None', norm_scale=1.0,
                tile_m=256):
    """x: (N, nfeat); adj: dense (N, N) row-normalized adjacency (spmm is done
    as a dense MXU matmul since Pallas has no sparse spmm primitive)."""
    assert norm_mode in ('None', 'PN', 'PN-SI', 'PN-SCS')
    n, nfeat = x.shape
    nhid = w1.shape[1]
    nclass = w2.shape[1]

    nhid_p = _round_up(nhid, LANE)
    nclass_p = _round_up(nclass, LANE)

    # Row tile for streaming adj; pad the node count so the grid divides evenly.
    tile_m = max(8, (tile_m // 8) * 8)
    tile_m = min(tile_m, _round_up(n, 8))
    n_p = _round_up(n, tile_m)

    f32, bf16 = jnp.float32, jnp.bfloat16

    # Zero-pad to lane-dense feature dims + tile-aligned node count; cast MXU
    # operands to bf16 (accumulation stays f32 inside the kernels).
    x_p = jnp.zeros((n_p, nfeat), bf16).at[:n].set(x.astype(bf16))
    adj_p = jnp.zeros((n_p, n_p), bf16).at[:n, :n].set(adj.astype(bf16))
    w1_p = jnp.zeros((nfeat, nhid_p), bf16).at[:, :nhid].set(w1.astype(bf16))
    b1_p = jnp.zeros((1, nhid_p), f32).at[:, :nhid].set(b1.astype(f32).reshape(1, nhid))
    w2_p = jnp.zeros((nhid_p, nclass_p), bf16).at[:nhid, :nclass].set(w2.astype(bf16))
    b2_p = jnp.zeros((1, nclass_p), f32).at[:, :nclass].set(b2.astype(f32).reshape(1, nclass))
    zeros_b1 = jnp.zeros((1, nhid_p), f32)

    # GraphConv 1: H1 = adj @ (x @ W1) + b1
    xw1 = _rowtile_matmul_bias(x_p, w1_p, zeros_b1, tile_m=tile_m, out_dtype=bf16)
    h1 = _rowtile_matmul_bias(adj_p, xw1, b1_p, tile_m=tile_m, out_dtype=f32)

    # PairNorm -> ReLU -> (h @ W2) on the real rows only (global stats must not
    # see padded rows, whose entries would be the bias).
    h1_valid = h1 if n_p == n else h1[:n]
    mw2 = _pairnorm_relu_matmul(h1_valid, w2_p, norm_mode=norm_mode,
                                norm_scale=norm_scale, out_dtype=bf16)

    # GraphConv 2: Y = adj @ MW2 + b2
    mw2_p = mw2 if n_p == n else jnp.zeros((n_p, nclass_p), bf16).at[:n].set(mw2)
    y = _rowtile_matmul_bias(adj_p, mw2_p, b2_p, tile_m=tile_m, out_dtype=f32)

    return y[:n, :nclass]


def init_graphconv_params(key, in_features, out_features):
    """Matches GraphConv.reset_parameters: uniform(-stdv, stdv), stdv=1/sqrt(out)."""
    stdv = 1.0 / jnp.sqrt(jnp.float32(out_features))
    kw, kb = jax.random.split(key)
    w = jax.random.uniform(kw, (in_features, out_features), jnp.float32,
                           minval=-stdv, maxval=stdv)
    b = jax.random.uniform(kb, (1, out_features), jnp.float32,
                           minval=-stdv, maxval=stdv)
    return w, b


def gcn_reference(x, adj, w1, b1, w2, b2, norm_mode='None', norm_scale=1.0):
    """Pure-JAX f32 reference of the eval-mode PyTorch forward."""
    h = adj @ (x @ w1) + b1
    if norm_mode != 'None':
        col_mean = h.mean(axis=0, keepdims=True)
        if norm_mode == 'PN':
            h = h - col_mean
            rn = jnp.sqrt(1e-6 + jnp.mean(jnp.sum(h * h, axis=1)))
            h = norm_scale * h / rn
        elif norm_mode == 'PN-SI':
            h = h - col_mean
            rn = jnp.sqrt(1e-6 + jnp.sum(h * h, axis=1, keepdims=True))
            h = norm_scale * h / rn
        elif norm_mode == 'PN-SCS':
            rn = jnp.sqrt(1e-6 + jnp.sum(h * h, axis=1, keepdims=True))
            h = norm_scale * h / rn - col_mean
    h = jnp.maximum(h, 0.0)
    return adj @ (h @ w2) + b2


if __name__ == "__main__":
    key = jax.random.PRNGKey(0)
    k_x, k_adj, k_gc1, k_gc2 = jax.random.split(key, 4)

    # Small synthetic graph; tile_m=128 -> 2 adj row tiles (exercises pipelining).
    n_nodes, nfeat, nhid, nclass = 256, 64, 32, 16
    tile_m = 128

    x = jax.random.normal(k_x, (n_nodes, nfeat), jnp.float32)

    # Dense row-normalized adjacency with self loops (stand-in for sparse spmm adj).
    a = (jax.random.uniform(k_adj, (n_nodes, n_nodes)) < 0.1).astype(jnp.float32)
    a = a + jnp.eye(n_nodes, dtype=jnp.float32)
    adj = a / jnp.sum(a, axis=1, keepdims=True)

    w1, b1 = init_graphconv_params(k_gc1, nfeat, nhid)
    w2, b2 = init_graphconv_params(k_gc2, nhid, nclass)

    ok = True
    for mode in ('None', 'PN', 'PN-SI', 'PN-SCS'):
        out = gcn_forward(x, adj, w1, b1, w2, b2,
                          norm_mode=mode, norm_scale=1.0, tile_m=tile_m)
        out = jax.block_until_ready(out)
        ref = gcn_reference(x, adj, w1, b1, w2, b2, norm_mode=mode, norm_scale=1.0)
        assert out.shape == (n_nodes, nclass)
        # bf16 MXU operands vs f32 reference -> loosened tolerance.
        if not jnp.allclose(out, ref, atol=3e-2, rtol=3e-2):
            print(f"MISMATCH mode={mode} max|err|={float(jnp.max(jnp.abs(out - ref)))}")
            ok = False

    if ok:
        print("KERNEL_OK")
</pallas_src>

<mosaic_0001>
module attributes {stable_mosaic.version = 11 : i64} {
  func.func @_rowtile_matmul_bias_kernel(%arg0: i32, %arg1: memref<128x64xbf16, #tpu.memory_space<vmem>>, %arg2: memref<64x128xbf16, #tpu.memory_space<vmem>>, %arg3: memref<1x128xf32, #tpu.memory_space<vmem>>, %arg4: memref<128x128xbf16, #tpu.memory_space<vmem>>) attributes {dimension_semantics = [#tpu.dimension_semantics<parallel>], iteration_bounds = array<i64: 2>, scalar_prefetch = 0 : i64, scratch_operands = 0 : i64, tpu.core_type = #tpu.core_type<tc>, window_params = [{transform_indices = @transform_0, window_bounds = array<i64: 128, 64>}, {pipeline_mode = #tpu.pipeline_mode<synchronous>, transform_indices = @transform_1, window_bounds = array<i64: 64, 128>}, {pipeline_mode = #tpu.pipeline_mode<synchronous>, transform_indices = @transform_2, window_bounds = array<i64: 1, 128>}, {transform_indices = @transform_3, window_bounds = array<i64: 128, 128>}]} {
    %c0 = arith.constant 0 : index
    %c0_0 = arith.constant 0 : index
    %0 = vector.load %arg1[%c0, %c0_0] : memref<128x64xbf16, #tpu.memory_space<vmem>>, vector<128x64xbf16>
    %c0_1 = arith.constant 0 : index
    %c0_2 = arith.constant 0 : index
    %1 = vector.load %arg2[%c0_1, %c0_2] : memref<64x128xbf16, #tpu.memory_space<vmem>>, vector<64x128xbf16>
    %cst = arith.constant dense<0.000000e+00> : vector<128x128xf32>
    %2 = tpu.matmul %0, %1, %cst {dimension_numbers = #tpu.dot_dimension_numbers<[1], [0], [0], [1], [0, 0, 1, 1], [], []>} : vector<128x64xbf16>, vector<64x128xbf16>, vector<128x128xf32> -> vector<128x128xf32>
    %c0_3 = arith.constant 0 : index
    %c0_4 = arith.constant 0 : index
    %3 = vector.load %arg3[%c0_3, %c0_4] : memref<1x128xf32, #tpu.memory_space<vmem>>, vector<1x128xf32>
    %4 = vector.broadcast %3 : vector<1x128xf32> to vector<128x128xf32>
    %5 = arith.addf %2, %4 : vector<128x128xf32>
    %6 = arith.truncf %5 : vector<128x128xf32> to vector<128x128xbf16>
    %c0_5 = arith.constant 0 : index
    %c0_6 = arith.constant 0 : index
    %7 = vector.load %arg4[%c0_5, %c0_6] : memref<128x128xbf16, #tpu.memory_space<vmem>>, vector<128x128xbf16>
    tpu.vector_store %arg4[%c0_5, %c0_6], %6 {strides = array<i32>} : memref<128x128xbf16, #tpu.memory_space<vmem>>, vector<128x128xbf16>,
    return
  }
  func.func @transform_0(%arg0: i32) -> (i32, i32) {
    %c0_i32 = arith.constant 0 : i32
    %c0_i32_0 = arith.constant 0 : i32
    return %arg0, %c0_i32 : i32, i32
  }
  func.func @transform_1(%arg0: i32) -> (i32, i32) {
    %c0_i32 = arith.constant 0 : i32
    %c0_i32_0 = arith.constant 0 : i32
    %c0_i32_1 = arith.constant 0 : i32
    return %c0_i32, %c0_i32_0 : i32, i32
  }
  func.func @transform_2(%arg0: i32) -> (i32, i32) {
    %c0_i32 = arith.constant 0 : i32
    %c0_i32_0 = arith.constant 0 : i32
    %c0_i32_1 = arith.constant 0 : i32
    return %c0_i32, %c0_i32_0 : i32, i32
  }
  func.func @transform_3(%arg0: i32) -> (i32, i32) {
    %c0_i32 = arith.constant 0 : i32
    %c0_i32_0 = arith.constant 0 : i32
    return %arg0, %c0_i32 : i32, i32
  }
}

</mosaic_0001>

<bundles_post_ra>
// kernel: tpu_custom_call.1
= control target key start
LH: loop header
LB: loop body
LE: loop exit
PB: predicated region body
PF: predicated region fallthrough
CT: control target
= control target key end

     0   :  { %8 = vsyncpa [#allocation3], 0  ;;  %s980_s0 = inlined_call_operand.vmem [shape: bf16[256,64], index: 0, kind: input, shape index: {}]   ;;  %s981_s1 = inlined_call_operand.vmem [shape: bf16[64,128], index: 1, kind: input, shape index: {}]   ;;  %s982_s2 = inlined_call_operand.vmem [shape: f32[1,128], index: 2, kind: input, shape index: {}]   ;;  %s983_s3 = inlined_call_operand.hbm [shape: bf16[256,128], index: 3, kind: output, shape index: {}]  }
   0x1   :  { %10 = vsyncpa [#allocation3 + $0x1], 0  ;;  %s841_s12 = smov 0   ;;  %s843_s13 = smov 0  }
   0x2   :  { %s845_s14 = smov 0   ;;  %s847_s15 = smov 0  }
   0x3 LB: > { %s862_s16 = sadd.s32 4294967295, %s816_s15   ;;  %s546_s17 = sadd.s32 4294967294, %s816_s15   ;;  %s816_s15 = sphi %s847_s15, %s989_s15   ;;  %s812_s14 = sphi %s845_s14, %s988_s14   ;;  %s808_s13 = sphi %s843_s13, %s987_s13   ;;  %s804_s12 = sphi %s841_s12, %s986_s12  }
   0x4   : > { %s866_s18 = sadd.s32 1, %s816_s15   ;;  %s91_s19 = sadd.s32 1, %s812_s14 }
   0x5   : > { %s88_s20 = ssub.s32 %s816_s15, %s866_s18  ;;  %p101_p0 = scmp.ne.s32.totalorder %s812_s14, %s808_s13 }
   0x6   : > { %p89_p1 = scmp.eq.s32.totalorder %s88_s20, 0  ;;  %p102_p2 = scmp.eq.s32.totalorder %s862_s16, 1 }
   0x7   : > { %p107_p3 = scmp.ne.s32.totalorder %s808_s13, %s804_s12  ;;  %p108_p4 = scmp.eq.s32.totalorder %s546_s17, 1 }
   0x8   : > { %s877_s21 = scalar_select %p89_p1, %s812_s14, %s91_s19  }
   0x9   : > { %p879_p5 = por %p102_p2, %p101_p0  ;;  %p883_p6 = por %p108_p4, %p107_p3 }
   0xa   : > { %p549_p7 = scmp.ge.s32.totalorder %s816_s15, 1  ;;  %p141_p8 = scmp.lt.s32.totalorder %s816_s15, 3 }
   0xc   : > { %p142_p9 = pnand %p549_p7, %p141_p8 }
   0xd   : > { %s551_s26 = sshll.u32 (!%p142_p9), %s862_s16, 4  ;;  %s162_s10 = sand.u32 (!%p142_p9), 1, %s808_s13  }
   0xe   : > { %145 = sbr.rel (%p142_p9) target bundleno = 261 (0x105), region = 32  ;;  %p166_p10 = scmp.lt.s32.totalorder (!%p142_p9), %s551_s26, 31 }
   0xf   : > { %s550_s19 = sshll.u32 (!%p142_p9), %s162_s10, 6  ;;  %s611_s24 = sshll.u32 (!%p142_p9), %s862_s16, 10 }
  0x10   : > { %s919_s20 = scalar_lea.vmem (!%p142_p9), [#allocation2], %s550_s19  ;;  %s930_s28 = scalar_lea.hbm (!%p142_p9), %s983_s3, %s611_s24 }
  0x11   : > { %s484_s25 = sshll.u32 (!%p142_p9), %s919_s20, 4  ;;  %s940_s16 = scalar_lea.sflag (!%p142_p9), [#allocation3], %s162_s10  ;;  %s932_s25 = int_to_ptr.vmem [resolvable:$true] %s484_s25 }
  0x12   : > { %s756_s29 = scalar_lea.vmem (!%p142_p9), %s932_s25, 1024  ;;  %s818_s30 = smov (!%p142_p9), [#allocation2]  }
  0x13   : > { %v744_v0 = vld [vmem:[%s981_s1 + $0x18] sm:$0xff]   ;;  %v745_v1 = vld [vmem:[%s981_s1 + $0x10] sm:$0xff]   ;;  %s991_s26 = smov (!%p166_p10, %s551_s26), 31  ;;  %v746_v2 = vld [vmem:[%s981_s1 + $0x8] sm:$0xff]   ;;  %vm268_vm0 = vcmask 523264   ;;  %p757_p11 = scmp.ne.s32.totalorder %s932_s25, %s756_s29 }
  0x14   : > { %671 = vmatprep.subr.bf16.mxu0 %v744_v0  ;;  %695 = vmatprep.subr.bf16.mxu1 %v744_v0  ;;  %s552_s4 = sshll.u32 %s991_s26, 2  ;;  %v747_v3 = vld [vmem:[%s981_s1] sm:$0xff]  }
  0x15   : > { %672 = vmatpush3.bf16.msra.mxu0 %v744_v0  ;;  %699 = vmatpush3.bf16.msra.mxu1 %v744_v0  ;;  %s169_s9 = scalar_lea.vmem %s980_s0, %s552_s4  ;;  %v553_v14 = vld [vmem:[%s982_s2] ss:$0 sm:$0xff]  ;;  %p758_p12 = pnand %p757_p11, %p879_p5 }
  0x16   : > { %673 = vmatprep.subr.bf16.mxu0 %v745_v1  ;;  %696 = vmatprep.subr.bf16.mxu1 %v745_v1  ;;  %v748_v4 = vld [vmem:[%s169_s9] sm:$0xff]   ;;  %v750_v6 = vld [vmem:[%s169_s9 + $0x8] sm:$0xff]   ;;  %v752_v8 = vld [vmem:[%s169_s9 + $0x10] sm:$0xff]   ;;  %s760_s4 = sshll.u32 %s818_s30, 4  ;;  %s761_s4 = int_to_ptr.vmem [resolvable:$false] %s760_s4 }
  0x17   : > { %v749_v5 = vld [vmem:[%s169_s9 + $0x20] sm:$0xff]   ;;  %679 = vmatprep.mubr.msk.bf16.mxu0 %vm268_vm0, %v748_v4  ;;  %v751_v7 = vld [vmem:[%s169_s9 + $0x28] sm:$0xff]   ;;  %v753_v9 = vld [vmem:[%s169_s9 + $0x30] sm:$0xff]   ;;  %p759_p13 = pneg %p758_p12  ;;  %s762_s5 = scalar_lea.vmem %s761_s4, 2048 }
  0x18   : > { %687 = vmatprep.mubr.msk.bf16.mxu1 %vm268_vm0, %v749_v5  ;;  %v754_v10 = vld [vmem:[%s169_s9 + $0x18] sm:$0xff]   ;;  %p763_p0 = scmp.lt.s32.totalorder %s932_s25, %s761_s4  ;;  %p764_p1 = scmp.lt.s32.totalorder %s762_s5, %s756_s29 }
  0x19   : > { %674 = vmatpush3.bf16.msra.mxu0 %v745_v1  ;;  %700 = vmatpush3.bf16.msra.mxu1 %v745_v1  ;;  %v755_v11 = vld [vmem:[%s169_s9 + $0x38] sm:$0xff]  }
  0x1a   : > { %675 = vmatprep.subr.bf16.mxu0 %v746_v2  ;;  %697 = vmatprep.subr.bf16.mxu1 %v746_v2  ;;  %p765_p2 = por %p764_p1, %p763_p0 }
  0x1c   : > { %p766_p3 = pnand %p765_p2, %p759_p13 }
  0x1d   : > { %676 = vmatpush3.bf16.msra.mxu0 %v746_v2  ;;  %701 = vmatpush3.bf16.msra.mxu1 %v746_v2 }
  0x1e   : > { %677 = vmatprep.subr.bf16.mxu0 %v747_v3  ;;  %698 = vmatprep.subr.bf16.mxu1 %v747_v3 }
  0x21   : > { %678 = vmatpush3.bf16.msra.mxu0 %v747_v3  ;;  %702 = vmatpush3.bf16.msra.mxu1 %v747_v3 }
  0x24   : > { %680 = vmatmul.mubr.msk.bf16.vlgmr.msra.gmra.mxu0 %vm268_vm0, %v750_v6  ;;  %688 = vmatmul.mubr.msk.bf16.vlgmr.msra.gmra.mxu1 %vm268_vm0, %v751_v7 }
  0x25   : > { %683 = vmatprep.mubr.msk.bf16.mxu0 %vm268_vm0, %v752_v8  ;;  %691 = vmatprep.mubr.msk.bf16.mxu1 %vm268_vm0, %v753_v9 }
  0x2c   : > { %684 = vmatmul.mubr.msk.bf16.gmra.mxu0 %vm268_vm0, %v754_v10  ;;  %692 = vmatmul.mubr.msk.bf16.gmra.mxu1 %vm268_vm0, %v755_v11 }
  0xe4   : > { %v681_v12 = vpop.f32.mrf.mxu0  ;;  %v689_v13 = vpop.f32.mrf.mxu1 }
  0xe5   : > { %v336_v19 = vadd.f32 %v681_v12, %v553_v14  ;;  %v368_v20 = vadd.f32 %v689_v13, %v553_v14 }
  0xe6   : > { %v327_v15 = vpop.f32.mrf.mxu0  ;;  %v359_v16 = vpop.f32.mrf.mxu1 }
  0xe7   : > { %v328_v23 = vadd.f32 %v553_v14, %v327_v15  ;;  %v360_v24 = vadd.f32 %v553_v14, %v359_v16 }
  0xe8   : > { %v682_v17 = vpop.f32.mrf.mxu0  ;;  %v690_v18 = vpop.f32.mrf.mxu1 }
  0xe9   : > { %v339_v21 = vadd.f32 %v682_v17, %v553_v14  ;;  %v371_v22 = vadd.f32 %v690_v18, %v553_v14 }
  0xea   : > { %v330_v25 = vpop.f32.mrf.mxu0  ;;  %v362_v26 = vpop.f32.mrf.mxu1 }
  0xeb   : > { %v620_v27 = vpack.c.bf16 %v339_v21, %v336_v19  ;;  %v640_v28 = vpack.c.bf16 %v371_v22, %v368_v20  ;;  %v331_v29 = vadd.f32 %v553_v14, %v330_v25  ;;  %v363_v30 = vadd.f32 %v553_v14, %v362_v26 }
  0xec   : > { %v685_v31 = vpop.f32.mrf.mxu0  ;;  %v693_v32 = vpop.f32.mrf.mxu1 }
  0xed   : > { %652 = vst [vmem:[%s919_s20 + $0x8] sm:$0xff] %v620_v27   ;;  %656 = vst [vmem:[%s919_s20 + $0x28] sm:$0xff] %v640_v28   ;;  %v615_v33 = vpack.c.bf16 %v331_v29, %v328_v23  ;;  %v635_v34 = vpack.c.bf16 %v363_v30, %v360_v24  ;;  %v352_v39 = vadd.f32 %v685_v31, %v553_v14 }
  0xee   : > { %v343_v35 = vpop.f32.mrf.mxu0  ;;  %v375_v36 = vpop.f32.mrf.mxu1  ;;  %v384_v40 = vadd.f32 %v693_v32, %v553_v14 }
  0xef   : > { %616 = vst [vmem:[%s919_s20] sm:$0xff] %v615_v33   ;;  %655 = vst [vmem:[%s919_s20 + $0x20] sm:$0xff] %v635_v34   ;;  %v344_v43 = vadd.f32 %v553_v14, %v343_v35  ;;  %v376_v44 = vadd.f32 %v553_v14, %v375_v36 }
  0xf0   : > { %v686_v37 = vpop.f32.mrf.mxu0  ;;  %v694_v38 = vpop.f32.mrf.mxu1 }
  0xf1   : > { %v355_v41 = vadd.f32 %v686_v37, %v553_v14  ;;  %v387_v42 = vadd.f32 %v694_v38, %v553_v14 }
  0xf2   : > { %v346_v45 = vpop.f32.mrf.mxu0  ;;  %v378_v46 = vpop.f32.mrf.mxu1 }
  0xf3   : > { %v630_v47 = vpack.c.bf16 %v355_v41, %v352_v39  ;;  %v650_v48 = vpack.c.bf16 %v387_v42, %v384_v40  ;;  %v347_v49 = vadd.f32 %v553_v14, %v346_v45  ;;  %v379_v50 = vadd.f32 %v553_v14, %v378_v46 }
  0xf5   : > { %654 = vst [vmem:[%s919_s20 + $0x18] sm:$0xff] %v630_v47   ;;  %658 = vst [vmem:[%s919_s20 + $0x38] sm:$0xff] %v650_v48   ;;  %v625_v51 = vpack.c.bf16 %v347_v49, %v344_v43  ;;  %v645_v52 = vpack.c.bf16 %v379_v50, %v376_v44 }
  0xf7   : > { %653 = vst [vmem:[%s919_s20 + $0x10] sm:$0xff] %v625_v51   ;;  %657 = vst [vmem:[%s919_s20 + $0x30] sm:$0xff] %v645_v52  }
  0xf8   : > { %769 = shalt.err (!%p766_p3)
}
  0xf9   : > { %s770_s6 = scalar_lea.hbm %s930_s28, 1024  ;;  %s774_s9 = scalar_lea.hbm %s983_s3, 2048 }
  0xfa   : > { %p771_p4 = scmp.ne.s32.totalorder %s930_s28, %s770_s6  ;;  %p775_p9 = scmp.lt.s32.totalorder %s930_s28, %s983_s3 }
  0xfb   : > { %p776_p10 = scmp.lt.s32.totalorder %s774_s9, %s770_s6 }
  0xfc   : > { %p772_p7 = pnand %p771_p4, %p879_p5 }
  0xfd   : > { %p777_p11 = por %p776_p10, %p775_p9 }
  0xfe   : > { %p773_p8 = pneg %p772_p7 }
 0x100   : > { %p778_p12 = pnand %p777_p11, %p773_p8 }
 0x102   : > { %781 = shalt.err (!%p778_p12)
}
 0x103   : > { %s819_s17 = smov 64   ;;  %s820_s19 = smov 4  }
 0x104   : > { %703 = dma.vmem_to_hbm [thread:$0]  (%p879_p5), %s932_s25, 1024, %s930_s28, %s940_s16, %s819_s17, %s819_s17, %s820_s19  }
 0x105 PF: > { %p709_p13 = scmp.ge.s32.totalorder %s816_s15, 2  ;;  %s499_s20 = sand.u32 1, %s804_s12  }
 0x106   : > { %s500_s24 = scalar_lea.sflag [#allocation3], %s499_s20 }
 0x107   : > { %p706_p0 = pnand %p709_p13, %p883_p6 }
 0x109   : > { %p707_p1 = pneg %p706_p0 }
 0x10b   : > { %799 = dma.done.wait (%p707_p1), %s500_s24, 1024  }
 0x10c   : > { %801 = vsyncadd (%p707_p1), %s500_s24, 4294966272  ;;  %p13_p2 = scmp.ge.s32.totalorder %s866_s18, 4   ;;  %s986_s12 = smov %s808_s13 }
 0x10d   : > { %s987_s13 = smov %s812_s14  ;;  %s988_s14 = smov %s877_s21 }
 0x10e   : > { %s989_s15 = smov %s866_s18  ;;  %15 = sbr.rel (!%p13_p2) target bundleno = 3 (0x3), region = 67 }
 0x113   :  { %505 = vsyncpa [#allocation3], 1 }
 0x114   :  { %507 = vsyncpa [#allocation3 + $0x1], 1 }

</bundles_post_ra>
